<compile_context>
chip_gen: v7x
topology: tpu7x:2x2x1
jax: 0.10.0
libtpu: 0.0.40
codegen_flags: <defaults>
</compile_context>

<pallas_src>
import functools

import jax
import jax.numpy as jnp
from jax.experimental import pallas as pl
from jax.experimental.pallas import tpu as pltpu


def _round_up(x, m):
    return (x + m - 1) // m * m


def _pick_tm(m_total):
    """Spatial (lane) tile width: multiple of 128, aims for >=8 grid steps (>=4 per v7x
    TensorCore) when M allows, capped so the f32 patch scratch stays ~1 MiB."""
    tm = (m_total // 8) // 128 * 128
    return int(min(2048, max(256, tm)))


def _conv_im2col_kernel(w_ref, xm_ref, xh_ref, o_ref, xwin_ref, pbuf_ref, *,
                        shifts, halo, tm, cinp):
    """One grid step: in-VMEM im2col assembly + one MXU dot.

    w_ref    : (Cout8, KPAD)        f32   folded conv weights + bias column (resident)
    xm_ref   : (CinP, TM)           f32   main body of the haloed flat-input window
    xh_ref   : (1, CinP, 2*HALO)    f32   right halo of the window
    o_ref    : (Cout8, TM)          bf16  conv output tile (lane-dense store)
    xwin_ref : (CinP, TM + 2*HALO)  f32   scratch: contiguous haloed window
    pbuf_ref : (KPAD, TM)           f32   scratch: im2col patch matrix
    """
    # Stitch the contiguous window (both copies are lane-aligned: TM, 2*HALO % 128 == 0).
    xwin_ref[:, :tm] = xm_ref[...]
    xwin_ref[:, tm:] = xh_ref[0]

    # 27 statically-shifted copies of the window build the patch matrix.  Stores are
    # sublane-aligned (CinP % 8 == 0) f32 slabs; only the loads are lane-offset, which is
    # cheap VPU/XLU filler work (the step is DMA/overhead bound, not VALU bound).
    for t, s in enumerate(shifts):
        pbuf_ref[t * cinp:(t + 1) * cinp, :] = xwin_ref[:, halo + s: halo + s + tm]

    # Bias row block: constant ones against the bias column of w_ref (bias folded into dot).
    k27 = 27 * cinp
    pbuf_ref[k27:k27 + 8, :] = jnp.ones((8, tm), jnp.float32)

    # Single MXU matmul, f32 accumulation, bf16 lane-dense store.
    o_ref[...] = jnp.dot(w_ref[...], pbuf_ref[...],
                         preferred_element_type=jnp.float32).astype(o_ref.dtype)


@functools.partial(jax.jit, static_argnames=("mode",))
def upsample_block_3d(x_ncdhw, weight, bias, mode="conv"):
    """Forward pass of UpsampleBlock3d.

    x_ncdhw : (B, Cin, D, H, W)        float32 (PyTorch NCDHW)
    weight  : (Cout*8, Cin, 3, 3, 3)   nn.Conv3d weight (OIDHW)
    bias    : (Cout*8,)
    returns : (B, Cout, 2D, 2H, 2W)    float32
    """
    if mode == "nearest":
        y = x_ncdhw
        for ax in (2, 3, 4):
            y = jnp.repeat(y, 2, axis=ax)
        return y

    B, Cin, D, H, W = x_ncdhw.shape
    Cout8 = weight.shape[0]
    Cout = Cout8 // 8

    Dp, Hp, Wp = D + 2, H + 2, W + 2
    Sp = Dp * Hp * Wp
    M = B * Sp                                # outputs computed on the padded grid
    R = Hp * Wp + Wp + 1                      # max |flat tap shift|
    HALO = _round_up(R, 128)                  # lane-aligned halo width (>= R)
    TM = _pick_tm(M)
    n_tiles = -(-M // TM)
    Mpad = n_tiles * TM

    CinP = _round_up(Cin, 8)                  # channel pad -> aligned patch stores
    K27 = 27 * CinP
    KPAD = K27 + 8                            # +8 rows: constant-ones bias block
    # TODO(synk): for large Cin (patch tile > a few MiB) add a K grid axis ("arbitrary")
    # with a resident f32 accumulator instead of one monolithic patch tile.

    # flat tap shifts; tap order (kd, kh, kw) matches the weight reshape below
    shifts = tuple((kd - 1) * Hp * Wp + (kh - 1) * Wp + (kw - 1)
                   for kd in range(3) for kh in range(3) for kw in range(3))

    # ---- glue (XLA): zero-pad + channel-major flatten; NO 27x im2col materialization -----
    xp = jnp.pad(x_ncdhw.astype(jnp.float32),
                 ((0, 0), (0, CinP - Cin), (1, 1), (1, 1), (1, 1)))     # (B,CinP,Dp,Hp,Wp)
    xflat = jnp.transpose(xp, (1, 0, 2, 3, 4)).reshape(CinP, M)         # (CinP, B*Sp)
    xhal = jnp.pad(xflat, ((0, 0), (HALO, HALO + Mpad - M)))            # (CinP, Mpad+2*HALO)
    # Small per-tile right-halo side array (main body is streamed exactly once by its spec).
    xhalo = jnp.stack([xhal[:, (i + 1) * TM:(i + 1) * TM + 2 * HALO]
                       for i in range(n_tiles)], axis=0)                # (n_tiles,CinP,2*HALO)

    # Folded weights: column order (kd, kh, kw, ci); bias in column K27, rest zero.
    w_t = jnp.transpose(weight.astype(jnp.float32), (0, 2, 3, 4, 1))    # (Cout8,3,3,3,Cin)
    w_t = jnp.pad(w_t, ((0, 0), (0, 0), (0, 0), (0, 0), (0, CinP - Cin)))
    w_t = w_t.reshape(Cout8, K27)
    w_pad = jnp.concatenate(
        [w_t, bias.reshape(Cout8, 1).astype(jnp.float32),
         jnp.zeros((Cout8, KPAD - K27 - 1), jnp.float32)], axis=1)      # (Cout8, KPAD)

    kernel = functools.partial(_conv_im2col_kernel, shifts=shifts, halo=HALO,
                               tm=TM, cinp=CinP)

    conv_flat = pl.pallas_call(
        kernel,
        out_shape=jax.ShapeDtypeStruct((Cout8, Mpad), jnp.bfloat16),
        grid_spec=pltpu.PrefetchScalarGridSpec(
            num_scalar_prefetch=0,
            grid=(n_tiles,),
            in_specs=[
                pl.BlockSpec((Cout8, KPAD), lambda i: (0, 0)),           # weights, resident
                pl.BlockSpec((CinP, TM), lambda i: (0, i)),              # main window body
                pl.BlockSpec((1, CinP, 2 * HALO), lambda i: (i, 0, 0)),  # right halo
            ],
            out_specs=pl.BlockSpec((Cout8, TM), lambda i: (0, i)),
            scratch_shapes=[
                pltpu.VMEM((CinP, TM + 2 * HALO), jnp.float32),          # stitched window
                pltpu.VMEM((KPAD, TM), jnp.float32),                     # patch matrix
            ],
        ),
        compiler_params=pltpu.CompilerParams(
            dimension_semantics=("parallel",),        # megacore-shardable on v7x
            vmem_limit_bytes=32 * 1024 * 1024,
        ),
    )(w_pad, xhal, xhalo)

    # ---- glue (XLA): drop padded-grid positions + pixel_shuffle_3d(scale=2) ---------------
    y = conv_flat[:, :M].reshape(Cout8, B, Dp, Hp, Wp)
    y = y[:, :, 1:1 + D, 1:1 + H, 1:1 + W].astype(jnp.float32)           # interior only
    y = y.reshape(Cout, 2, 2, 2, B, D, H, W)
    y = jnp.transpose(y, (4, 0, 5, 1, 6, 2, 7, 3))                       # (B,C,D,r1,H,r2,W,r3)
    return y.reshape(B, Cout, 2 * D, 2 * H, 2 * W)


def _reference_forward(x, weight, bias):
    """Pure-JAX f32 reference mirroring the PyTorch module (NCDHW)."""
    y = jax.lax.conv_general_dilated(
        x, weight, window_strides=(1, 1, 1),
        padding=((1, 1), (1, 1), (1, 1)),
        dimension_numbers=("NCDHW", "OIDHW", "NCDHW"),
        precision=jax.lax.Precision.HIGHEST,
    )
    y = y + bias.reshape(1, -1, 1, 1, 1)
    B, C, D, H, W = y.shape
    C_ = C // 8
    y = y.reshape(B, C_, 2, 2, 2, D, H, W)
    y = jnp.transpose(y, (0, 1, 5, 2, 6, 3, 7, 4))
    return y.reshape(B, C_, 2 * D, 2 * H, 2 * W)


if __name__ == "__main__":
    key = jax.random.PRNGKey(0)
    B, Cin, Cout = 2, 4, 4
    D = H = W = 8

    k1, k2, k3 = jax.random.split(key, 3)
    x = jax.random.normal(k1, (B, Cin, D, H, W), dtype=jnp.float32)
    # deterministic synthetic Conv3d parameters (nn.Conv3d(Cin, Cout*8, 3, padding=1))
    weight = 0.1 * jax.random.normal(k2, (Cout * 8, Cin, 3, 3, 3), dtype=jnp.float32)
    bias = 0.1 * jax.random.normal(k3, (Cout * 8,), dtype=jnp.float32)

    out = upsample_block_3d(x, weight, bias, mode="conv")
    out = jax.block_until_ready(out)

    assert out.shape == (B, Cout, 2 * D, 2 * H, 2 * W), out.shape

    ref = _reference_forward(x, weight, bias)
    err = float(jnp.max(jnp.abs(out - ref)))
    # f32 activations/weights into the MXU (f32 accumulation) + bf16 output store:
    # worst-case abs err is dominated by the bf16 writeback (~0.4% of |y|, |y| up to ~4)
    # plus MXU rounding; 4e-2 is a safe bound.  Use an f32 out_shape if tighter parity
    # with PyTorch f32 is required.
    assert err < 4e-2, f"max abs error too large: {err}"

    print("KERNEL_OK")
</pallas_src>

<mosaic_0001>
module attributes {stable_mosaic.version = 11 : i64} {
  func.func @_conv_im2col_kernel(%arg0: i32, %arg1: memref<32x224xf32, #tpu.memory_space<vmem>>, %arg2: memref<8x256xf32, #tpu.memory_space<vmem>>, %arg3: memref<1x8x256xf32, #tpu.memory_space<vmem>>, %arg4: memref<32x256xbf16, #tpu.memory_space<vmem>>, %arg5: memref<8x512xf32, #tpu.memory_space<vmem>>, %arg6: memref<224x256xf32, #tpu.memory_space<vmem>>) attributes {dimension_semantics = [#tpu.dimension_semantics<parallel>], iteration_bounds = array<i64: 8>, scalar_prefetch = 0 : i64, scratch_operands = 2 : i64, tpu.core_type = #tpu.core_type<tc>, window_params = [{pipeline_mode = #tpu.pipeline_mode<synchronous>, transform_indices = @transform_0, window_bounds = array<i64: 32, 224>}, {transform_indices = @transform_1, window_bounds = array<i64: 8, 256>}, {transform_indices = @transform_2, window_bounds = array<i64: 1, 8, 256>}, {transform_indices = @transform_3, window_bounds = array<i64: 32, 256>}]} {
    %c0 = arith.constant 0 : index
    %c0_0 = arith.constant 0 : index
    %0 = vector.load %arg2[%c0, %c0_0] : memref<8x256xf32, #tpu.memory_space<vmem>>, vector<8x256xf32>
    %c0_1 = arith.constant 0 : index
    %c0_2 = arith.constant 0 : index
    %1 = vector.load %arg5[%c0_1, %c0_2] : memref<8x512xf32, #tpu.memory_space<vmem>>, vector<8x256xf32>
    tpu.vector_store %arg5[%c0_1, %c0_2], %0 {strides = array<i32>} : memref<8x512xf32, #tpu.memory_space<vmem>>, vector<8x256xf32>,
    %c0_3 = arith.constant 0 : index
    %c0_4 = arith.constant 0 : index
    %c0_5 = arith.constant 0 : index
    %2 = vector.load %arg3[%c0_3, %c0_4, %c0_5] : memref<1x8x256xf32, #tpu.memory_space<vmem>>, vector<1x8x256xf32>
    %3 = vector.shape_cast %2 : vector<1x8x256xf32> to vector<8x256xf32>
    %c0_6 = arith.constant 0 : index
    %c256 = arith.constant 256 : index
    %4 = vector.load %arg5[%c0_6, %c256] : memref<8x512xf32, #tpu.memory_space<vmem>>, vector<8x256xf32>
    tpu.vector_store %arg5[%c0_6, %c256], %3 {strides = array<i32>} : memref<8x512xf32, #tpu.memory_space<vmem>>, vector<8x256xf32>,
    %c0_7 = arith.constant 0 : index
    %c17 = arith.constant 17 : index
    %5 = vector.load %arg5[%c0_7, %c17] : memref<8x512xf32, #tpu.memory_space<vmem>>, vector<8x256xf32>
    %c0_8 = arith.constant 0 : index
    %c0_9 = arith.constant 0 : index
    %6 = vector.load %arg6[%c0_8, %c0_9] : memref<224x256xf32, #tpu.memory_space<vmem>>, vector<8x256xf32>
    tpu.vector_store %arg6[%c0_8, %c0_9], %5 {strides = array<i32>} : memref<224x256xf32, #tpu.memory_space<vmem>>, vector<8x256xf32>,
    %c0_10 = arith.constant 0 : index
    %c18 = arith.constant 18 : index
    %7 = vector.load %arg5[%c0_10, %c18] : memref<8x512xf32, #tpu.memory_space<vmem>>, vector<8x256xf32>
    %c8 = arith.constant 8 : index
    %c0_11 = arith.constant 0 : index
    %8 = vector.load %arg6[%c8, %c0_11] : memref<224x256xf32, #tpu.memory_space<vmem>>, vector<8x256xf32>
    tpu.vector_store %arg6[%c8, %c0_11], %7 {strides = array<i32>} : memref<224x256xf32, #tpu.memory_space<vmem>>, vector<8x256xf32>,
    %c0_12 = arith.constant 0 : index
    %c19 = arith.constant 19 : index
    %9 = vector.load %arg5[%c0_12, %c19] : memref<8x512xf32, #tpu.memory_space<vmem>>, vector<8x256xf32>
    %c16 = arith.constant 16 : index
    %c0_13 = arith.constant 0 : index
    %10 = vector.load %arg6[%c16, %c0_13] : memref<224x256xf32, #tpu.memory_space<vmem>>, vector<8x256xf32>
    tpu.vector_store %arg6[%c16, %c0_13], %9 {strides = array<i32>} : memref<224x256xf32, #tpu.memory_space<vmem>>, vector<8x256xf32>,
    %c0_14 = arith.constant 0 : index
    %c27 = arith.constant 27 : index
    %11 = vector.load %arg5[%c0_14, %c27] : memref<8x512xf32, #tpu.memory_space<vmem>>, vector<8x256xf32>
    %c24 = arith.constant 24 : index
    %c0_15 = arith.constant 0 : index
    %12 = vector.load %arg6[%c24, %c0_15] : memref<224x256xf32, #tpu.memory_space<vmem>>, vector<8x256xf32>
    tpu.vector_store %arg6[%c24, %c0_15], %11 {strides = array<i32>} : memref<224x256xf32, #tpu.memory_space<vmem>>, vector<8x256xf32>,
    %c0_16 = arith.constant 0 : index
    %c28 = arith.constant 28 : index
    %13 = vector.load %arg5[%c0_16, %c28] : memref<8x512xf32, #tpu.memory_space<vmem>>, vector<8x256xf32>
    %c32 = arith.constant 32 : index
    %c0_17 = arith.constant 0 : index
    %14 = vector.load %arg6[%c32, %c0_17] : memref<224x256xf32, #tpu.memory_space<vmem>>, vector<8x256xf32>
    tpu.vector_store %arg6[%c32, %c0_17], %13 {strides = array<i32>} : memref<224x256xf32, #tpu.memory_space<vmem>>, vector<8x256xf32>,
    %c0_18 = arith.constant 0 : index
    %c29 = arith.constant 29 : index
    %15 = vector.load %arg5[%c0_18, %c29] : memref<8x512xf32, #tpu.memory_space<vmem>>, vector<8x256xf32>
    %c40 = arith.constant 40 : index
    %c0_19 = arith.constant 0 : index
    %16 = vector.load %arg6[%c40, %c0_19] : memref<224x256xf32, #tpu.memory_space<vmem>>, vector<8x256xf32>
    tpu.vector_store %arg6[%c40, %c0_19], %15 {strides = array<i32>} : memref<224x256xf32, #tpu.memory_space<vmem>>, vector<8x256xf32>,
    %c0_20 = arith.constant 0 : index
    %c37 = arith.constant 37 : index
    %17 = vector.load %arg5[%c0_20, %c37] : memref<8x512xf32, #tpu.memory_space<vmem>>, vector<8x256xf32>
    %c48 = arith.constant 48 : index
    %c0_21 = arith.constant 0 : index
    %18 = vector.load %arg6[%c48, %c0_21] : memref<224x256xf32, #tpu.memory_space<vmem>>, vector<8x256xf32>
    tpu.vector_store %arg6[%c48, %c0_21], %17 {strides = array<i32>} : memref<224x256xf32, #tpu.memory_space<vmem>>, vector<8x256xf32>,
    %c0_22 = arith.constant 0 : index
    %c38 = arith.constant 38 : index
    %19 = vector.load %arg5[%c0_22, %c38] : memref<8x512xf32, #tpu.memory_space<vmem>>, vector<8x256xf32>
    %c56 = arith.constant 56 : index
    %c0_23 = arith.constant 0 : index
    %20 = vector.load %arg6[%c56, %c0_23] : memref<224x256xf32, #tpu.memory_space<vmem>>, vector<8x256xf32>
    tpu.vector_store %arg6[%c56, %c0_23], %19 {strides = array<i32>} : memref<224x256xf32, #tpu.memory_space<vmem>>, vector<8x256xf32>,
    %c0_24 = arith.constant 0 : index
    %c39 = arith.constant 39 : index
    %21 = vector.load %arg5[%c0_24, %c39] : memref<8x512xf32, #tpu.memory_space<vmem>>, vector<8x256xf32>
    %c64 = arith.constant 64 : index
    %c0_25 = arith.constant 0 : index
    %22 = vector.load %arg6[%c64, %c0_25] : memref<224x256xf32, #tpu.memory_space<vmem>>, vector<8x256xf32>
    tpu.vector_store %arg6[%c64, %c0_25], %21 {strides = array<i32>} : memref<224x256xf32, #tpu.memory_space<vmem>>, vector<8x256xf32>,
    %c0_26 = arith.constant 0 : index
    %c117 = arith.constant 117 : index
    %23 = vector.load %arg5[%c0_26, %c117] : memref<8x512xf32, #tpu.memory_space<vmem>>, vector<8x256xf32>
    %c72 = arith.constant 72 : index
    %c0_27 = arith.constant 0 : index
    %24 = vector.load %arg6[%c72, %c0_27] : memref<224x256xf32, #tpu.memory_space<vmem>>, vector<8x256xf32>
    tpu.vector_store %arg6[%c72, %c0_27], %23 {strides = array<i32>} : memref<224x256xf32, #tpu.memory_space<vmem>>, vector<8x256xf32>,
    %c0_28 = arith.constant 0 : index
    %c118 = arith.constant 118 : index
    %25 = vector.load %arg5[%c0_28, %c118] : memref<8x512xf32, #tpu.memory_space<vmem>>, vector<8x256xf32>
    %c80 = arith.constant 80 : index
    %c0_29 = arith.constant 0 : index
    %26 = vector.load %arg6[%c80, %c0_29] : memref<224x256xf32, #tpu.memory_space<vmem>>, vector<8x256xf32>
    tpu.vector_store %arg6[%c80, %c0_29], %25 {strides = array<i32>} : memref<224x256xf32, #tpu.memory_space<vmem>>, vector<8x256xf32>,
    %c0_30 = arith.constant 0 : index
    %c119 = arith.constant 119 : index
    %27 = vector.load %arg5[%c0_30, %c119] : memref<8x512xf32, #tpu.memory_space<vmem>>, vector<8x256xf32>
    %c88 = arith.constant 88 : index
    %c0_31 = arith.constant 0 : index
    %28 = vector.load %arg6[%c88, %c0_31] : memref<224x256xf32, #tpu.memory_space<vmem>>, vector<8x256xf32>
    tpu.vector_store %arg6[%c88, %c0_31], %27 {strides = array<i32>} : memref<224x256xf32, #tpu.memory_space<vmem>>, vector<8x256xf32>,
    %c0_32 = arith.constant 0 : index
    %c127 = arith.constant 127 : index
    %29 = vector.load %arg5[%c0_32, %c127] : memref<8x512xf32, #tpu.memory_space<vmem>>, vector<8x256xf32>
    %c96 = arith.constant 96 : index
    %c0_33 = arith.constant 0 : index
    %30 = vector.load %arg6[%c96, %c0_33] : memref<224x256xf32, #tpu.memory_space<vmem>>, vector<8x256xf32>
    tpu.vector_store %arg6[%c96, %c0_33], %29 {strides = array<i32>} : memref<224x256xf32, #tpu.memory_space<vmem>>, vector<8x256xf32>,
    %c0_34 = arith.constant 0 : index
    %c128 = arith.constant 128 : index
    %31 = vector.load %arg5[%c0_34, %c128] : memref<8x512xf32, #tpu.memory_space<vmem>>, vector<8x256xf32>
    %c104 = arith.constant 104 : index
    %c0_35 = arith.constant 0 : index
    %32 = vector.load %arg6[%c104, %c0_35] : memref<224x256xf32, #tpu.memory_space<vmem>>, vector<8x256xf32>
    tpu.vector_store %arg6[%c104, %c0_35], %31 {strides = array<i32>} : memref<224x256xf32, #tpu.memory_space<vmem>>, vector<8x256xf32>,
    %c0_36 = arith.constant 0 : index
    %c129 = arith.constant 129 : index
    %33 = vector.load %arg5[%c0_36, %c129] : memref<8x512xf32, #tpu.memory_space<vmem>>, vector<8x256xf32>
    %c112 = arith.constant 112 : index
    %c0_37 = arith.constant 0 : index
    %34 = vector.load %arg6[%c112, %c0_37] : memref<224x256xf32, #tpu.memory_space<vmem>>, vector<8x256xf32>
    tpu.vector_store %arg6[%c112, %c0_37], %33 {strides = array<i32>} : memref<224x256xf32, #tpu.memory_space<vmem>>, vector<8x256xf32>,
    %c0_38 = arith.constant 0 : index
    %c137 = arith.constant 137 : index
    %35 = vector.load %arg5[%c0_38, %c137] : memref<8x512xf32, #tpu.memory_space<vmem>>, vector<8x256xf32>
    %c120 = arith.constant 120 : index
    %c0_39 = arith.constant 0 : index
    %36 = vector.load %arg6[%c120, %c0_39] : memref<224x256xf32, #tpu.memory_space<vmem>>, vector<8x256xf32>
    tpu.vector_store %arg6[%c120, %c0_39], %35 {strides = array<i32>} : memref<224x256xf32, #tpu.memory_space<vmem>>, vector<8x256xf32>,
    %c0_40 = arith.constant 0 : index
    %c138 = arith.constant 138 : index
    %37 = vector.load %arg5[%c0_40, %c138] : memref<8x512xf32, #tpu.memory_space<vmem>>, vector<8x256xf32>
    %c128_41 = arith.constant 128 : index
    %c0_42 = arith.constant 0 : index
    %38 = vector.load %arg6[%c128_41, %c0_42] : memref<224x256xf32, #tpu.memory_space<vmem>>, vector<8x256xf32>
    tpu.vector_store %arg6[%c128_41, %c0_42], %37 {strides = array<i32>} : memref<224x256xf32, #tpu.memory_space<vmem>>, vector<8x256xf32>,
    %c0_43 = arith.constant 0 : index
    %c139 = arith.constant 139 : index
    %39 = vector.load %arg5[%c0_43, %c139] : memref<8x512xf32, #tpu.memory_space<vmem>>, vector<8x256xf32>
    %c136 = arith.constant 136 : index
    %c0_44 = arith.constant 0 : index
    %40 = vector.load %arg6[%c136, %c0_44] : memref<224x256xf32, #tpu.memory_space<vmem>>, vector<8x256xf32>
    tpu.vector_store %arg6[%c136, %c0_44], %39 {strides = array<i32>} : memref<224x256xf32, #tpu.memory_space<vmem>>, vector<8x256xf32>,
    %c0_45 = arith.constant 0 : index
    %c217 = arith.constant 217 : index
    %41 = vector.load %arg5[%c0_45, %c217] : memref<8x512xf32, #tpu.memory_space<vmem>>, vector<8x256xf32>
    %c144 = arith.constant 144 : index
    %c0_46 = arith.constant 0 : index
    %42 = vector.load %arg6[%c144, %c0_46] : memref<224x256xf32, #tpu.memory_space<vmem>>, vector<8x256xf32>
    tpu.vector_store %arg6[%c144, %c0_46], %41 {strides = array<i32>} : memref<224x256xf32, #tpu.memory_space<vmem>>, vector<8x256xf32>,
    %c0_47 = arith.constant 0 : index
    %c218 = arith.constant 218 : index
    %43 = vector.load %arg5[%c0_47, %c218] : memref<8x512xf32, #tpu.memory_space<vmem>>, vector<8x256xf32>
    %c152 = arith.constant 152 : index
    %c0_48 = arith.constant 0 : index
    %44 = vector.load %arg6[%c152, %c0_48] : memref<224x256xf32, #tpu.memory_space<vmem>>, vector<8x256xf32>
    tpu.vector_store %arg6[%c152, %c0_48], %43 {strides = array<i32>} : memref<224x256xf32, #tpu.memory_space<vmem>>, vector<8x256xf32>,
    %c0_49 = arith.constant 0 : index
    %c219 = arith.constant 219 : index
    %45 = vector.load %arg5[%c0_49, %c219] : memref<8x512xf32, #tpu.memory_space<vmem>>, vector<8x256xf32>
    %c160 = arith.constant 160 : index
    %c0_50 = arith.constant 0 : index
    %46 = vector.load %arg6[%c160, %c0_50] : memref<224x256xf32, #tpu.memory_space<vmem>>, vector<8x256xf32>
    tpu.vector_store %arg6[%c160, %c0_50], %45 {strides = array<i32>} : memref<224x256xf32, #tpu.memory_space<vmem>>, vector<8x256xf32>,
    %c0_51 = arith.constant 0 : index
    %c227 = arith.constant 227 : index
    %47 = vector.load %arg5[%c0_51, %c227] : memref<8x512xf32, #tpu.memory_space<vmem>>, vector<8x256xf32>
    %c168 = arith.constant 168 : index
    %c0_52 = arith.constant 0 : index
    %48 = vector.load %arg6[%c168, %c0_52] : memref<224x256xf32, #tpu.memory_space<vmem>>, vector<8x256xf32>
    tpu.vector_store %arg6[%c168, %c0_52], %47 {strides = array<i32>} : memref<224x256xf32, #tpu.memory_space<vmem>>, vector<8x256xf32>,
    %c0_53 = arith.constant 0 : index
    %c228 = arith.constant 228 : index
    %49 = vector.load %arg5[%c0_53, %c228] : memref<8x512xf32, #tpu.memory_space<vmem>>, vector<8x256xf32>
    %c176 = arith.constant 176 : index
    %c0_54 = arith.constant 0 : index
    %50 = vector.load %arg6[%c176, %c0_54] : memref<224x256xf32, #tpu.memory_space<vmem>>, vector<8x256xf32>
    tpu.vector_store %arg6[%c176, %c0_54], %49 {strides = array<i32>} : memref<224x256xf32, #tpu.memory_space<vmem>>, vector<8x256xf32>,
    %c0_55 = arith.constant 0 : index
    %c229 = arith.constant 229 : index
    %51 = vector.load %arg5[%c0_55, %c229] : memref<8x512xf32, #tpu.memory_space<vmem>>, vector<8x256xf32>
    %c184 = arith.constant 184 : index
    %c0_56 = arith.constant 0 : index
    %52 = vector.load %arg6[%c184, %c0_56] : memref<224x256xf32, #tpu.memory_space<vmem>>, vector<8x256xf32>
    tpu.vector_store %arg6[%c184, %c0_56], %51 {strides = array<i32>} : memref<224x256xf32, #tpu.memory_space<vmem>>, vector<8x256xf32>,
    %c0_57 = arith.constant 0 : index
    %c237 = arith.constant 237 : index
    %53 = vector.load %arg5[%c0_57, %c237] : memref<8x512xf32, #tpu.memory_space<vmem>>, vector<8x256xf32>
    %c192 = arith.constant 192 : index
    %c0_58 = arith.constant 0 : index
    %54 = vector.load %arg6[%c192, %c0_58] : memref<224x256xf32, #tpu.memory_space<vmem>>, vector<8x256xf32>
    tpu.vector_store %arg6[%c192, %c0_58], %53 {strides = array<i32>} : memref<224x256xf32, #tpu.memory_space<vmem>>, vector<8x256xf32>,
    %c0_59 = arith.constant 0 : index
    %c238 = arith.constant 238 : index
    %55 = vector.load %arg5[%c0_59, %c238] : memref<8x512xf32, #tpu.memory_space<vmem>>, vector<8x256xf32>
    %c200 = arith.constant 200 : index
    %c0_60 = arith.constant 0 : index
    %56 = vector.load %arg6[%c200, %c0_60] : memref<224x256xf32, #tpu.memory_space<vmem>>, vector<8x256xf32>
    tpu.vector_store %arg6[%c200, %c0_60], %55 {strides = array<i32>} : memref<224x256xf32, #tpu.memory_space<vmem>>, vector<8x256xf32>,
    %c0_61 = arith.constant 0 : index
    %c239 = arith.constant 239 : index
    %57 = vector.load %arg5[%c0_61, %c239] : memref<8x512xf32, #tpu.memory_space<vmem>>, vector<8x256xf32>
    %c208 = arith.constant 208 : index
    %c0_62 = arith.constant 0 : index
    %58 = vector.load %arg6[%c208, %c0_62] : memref<224x256xf32, #tpu.memory_space<vmem>>, vector<8x256xf32>
    tpu.vector_store %arg6[%c208, %c0_62], %57 {strides = array<i32>} : memref<224x256xf32, #tpu.memory_space<vmem>>, vector<8x256xf32>,
    %cst = arith.constant 1.000000e+00 : f32
    %59 = vector.broadcast %cst : f32 to vector<8x256xf32>
    %c216 = arith.constant 216 : index
    %c0_63 = arith.constant 0 : index
    %60 = vector.load %arg6[%c216, %c0_63] : memref<224x256xf32, #tpu.memory_space<vmem>>, vector<8x256xf32>
    tpu.vector_store %arg6[%c216, %c0_63], %59 {strides = array<i32>} : memref<224x256xf32, #tpu.memory_space<vmem>>, vector<8x256xf32>,
    %c0_64 = arith.constant 0 : index
    %c0_65 = arith.constant 0 : index
    %61 = vector.load %arg1[%c0_64, %c0_65] : memref<32x224xf32, #tpu.memory_space<vmem>>, vector<32x224xf32>
    %c0_66 = arith.constant 0 : index
    %c0_67 = arith.constant 0 : index
    %62 = vector.load %arg6[%c0_66, %c0_67] : memref<224x256xf32, #tpu.memory_space<vmem>>, vector<224x256xf32>
    %cst_68 = arith.constant dense<0.000000e+00> : vector<32x256xf32>
    %63 = tpu.matmul %61, %62, %cst_68 {dimension_numbers = #tpu.dot_dimension_numbers<[1], [0], [0], [1], [0, 0, 1, 1], [], []>} : vector<32x224xf32>, vector<224x256xf32>, vector<32x256xf32> -> vector<32x256xf32>
    %64 = arith.truncf %63 : vector<32x256xf32> to vector<32x256xbf16>
    %c0_69 = arith.constant 0 : index
    %c0_70 = arith.constant 0 : index
    %65 = vector.load %arg4[%c0_69, %c0_70] : memref<32x256xbf16, #tpu.memory_space<vmem>>, vector<32x256xbf16>
    tpu.vector_store %arg4[%c0_69, %c0_70], %64 {strides = array<i32>} : memref<32x256xbf16, #tpu.memory_space<vmem>>, vector<32x256xbf16>,
    return
  }
  func.func @transform_0(%arg0: i32) -> (i32, i32) {
    %c0_i32 = arith.constant 0 : i32
    %c0_i32_0 = arith.constant 0 : i32
    %c0_i32_1 = arith.constant 0 : i32
    return %c0_i32, %c0_i32_0 : i32, i32
  }
  func.func @transform_1(%arg0: i32) -> (i32, i32) {
    %c0_i32 = arith.constant 0 : i32
    %c0_i32_0 = arith.constant 0 : i32
    return %c0_i32, %arg0 : i32, i32
  }
  func.func @transform_2(%arg0: i32) -> (i32, i32, i32) {
    %c0_i32 = arith.constant 0 : i32
    %c0_i32_0 = arith.constant 0 : i32
    %c0_i32_1 = arith.constant 0 : i32
    return %arg0, %c0_i32, %c0_i32_0 : i32, i32, i32
  }
  func.func @transform_3(%arg0: i32) -> (i32, i32) {
    %c0_i32 = arith.constant 0 : i32
    %c0_i32_0 = arith.constant 0 : i32
    return %c0_i32, %arg0 : i32, i32
  }
}

</mosaic_0001>

<bundles_post_ra>
// kernel: upsample_block_3d.1
= control target key start
LH: loop header
LB: loop body
LE: loop exit
PB: predicated region body
PF: predicated region fallthrough
CT: control target
= control target key end

     0   :  { %s1371_s12 = smov 0   ;;  %s1373_s13 = smov 0   ;;  %s1484_s0 = inlined_call_operand.vmem [shape: f32[32,224], index: 0, kind: input, shape index: {}]   ;;  %s1485_s1 = inlined_call_operand.vmem [shape: f32[8,2304], index: 1, kind: input, shape index: {}]   ;;  %s1486_s2 = inlined_call_operand.vmem [shape: f32[8,8,256], index: 2, kind: input, shape index: {}]   ;;  %s1487_s3 = inlined_call_operand.vmem [shape: bf16[32,2048], index: 3, kind: output, shape index: {}]  }
   0x1   :  { %s1375_s14 = smov 0  }
   0x2 LB: > { %s1384_s15 = sadd.s32 4294967295, %s1322_s14   ;;  %s1386_s16 = sadd.s32 1, %s1322_s14   ;;  %s1322_s14 = sphi %s1375_s14, %s1491_s14   ;;  %s1318_s13 = sphi %s1373_s13, %s1490_s13   ;;  %s1314_s12 = sphi %s1371_s12, %s1489_s12  }
   0x3   : > { %s90_s17 = ssub.s32 %s1322_s14, %s1386_s16  ;;  %s93_s18 = sadd.s32 1, %s1318_s13 }
   0x4   : > { %p91_p0 = scmp.eq.s32.totalorder %s90_s17, 0  ;;  %p103_p1 = scmp.ne.s32.totalorder %s1318_s13, %s1314_s12 }
   0x5   : > { %p104_p2 = scmp.eq.s32.totalorder %s1384_s15, 7  ;;  %p1010_p3 = scmp.ge.s32.totalorder %s1322_s14, 1 }
   0x6   : > { %s1394_s19 = scalar_select %p91_p0, %s1318_s13, %s93_s18  }
   0x7   : > { %p1396_p4 = por %p104_p2, %p103_p1  ;;  %p148_p5 = scmp.lt.s32.totalorder %s1322_s14, 9 }
   0x9   : > { %p149_p6 = pnand %p1010_p3, %p148_p5 }
   0xa   : > { %s1012_s21 = sshll.u32 (!%p149_p6), %s1384_s15, 1  ;;  %p182_p7 = scmp.lt.s32.totalorder (!%p149_p6), %s1384_s15, 7  ;;  %v697_v6 = vld [vmem:[%s1484_s0 + $0x8] sm:$0xff] (!%p149_p6)  ;;  %vm760_vm0 = vcmask (!%p149_p6), 785408   ;;  %vm208_vm1 = vcmask (!%p149_p6), 908288   ;;  %vm227_vm2 = vcmask (!%p149_p6), 900096  }
   0xb   : > { %152 = sbr.rel (%p149_p6) target bundleno = 477 (0x1dd), region = 32  ;;  %p177_p8 = scmp.lt.s32.totalorder (!%p149_p6), %s1012_s21, 17  ;;  %v701_v7 = vld [vmem:[%s1484_s0 + $0x28] sm:$0xff] (!%p149_p6)  ;;  %1016 = vmatprep.mubr.msk.f32.mxu0 (!%p149_p6), %vm760_vm0, %v697_v6  ;;  %vm265_vm3 = vcmask (!%p149_p6), 826368   ;;  %vm246_vm4 = vcmask (!%p149_p6), 891904   ;;  %vm303_vm5 = vcmask (!%p149_p6), 809984  }
   0xc   : > { %s1324_s4 = smov (!%p149_p6), 111   ;;  %s1325_s5 = smov (!%p149_p6), 110   ;;  %1018 = vmatprep.mubr.msk.f32.mxu1 (!%p149_p6), %vm760_vm0, %v701_v7  ;;  %vm284_vm6 = vcmask (!%p149_p6), 818176   ;;  %vm341_vm7 = vcmask (!%p149_p6), 736256   ;;  %vm322_vm8 = vcmask (!%p149_p6), 744448   ;;  %vm379_vm9 = vcmask (!%p149_p6), 89088  }
   0xd   : > { %s1326_s6 = smov (!%p149_p6), 101   ;;  %s1327_s7 = smov (!%p149_p6), 109   ;;  %vm360_vm10 = vcmask (!%p149_p6), 728064   ;;  %vm417_vm11 = vcmask (!%p149_p6), 72704   ;;  %vm398_vm12 = vcmask (!%p149_p6), 80896   ;;  %vm436_vm13 = vcmask (!%p149_p6), 7168  }
   0xe   : > { %s1328_s8 = smov (!%p149_p6), 99   ;;  %s1329_s9 = smov (!%p149_p6), 100   ;;  %vm478_vm14 = vcmask (!%p149_p6), 973824   ;;  %vm459_vm15 = vcmask (!%p149_p6), 1039360  }
   0xf   : > { %s1330_s10 = smov (!%p149_p6), 90   ;;  %s1331_s11 = smov (!%p149_p6), 91  }
  0x10   : > { %s1332_s14 = smov (!%p149_p6), 11   ;;  %s1333_s17 = smov (!%p149_p6), 89  }
  0x11   : > { %s1334_s18 = smov (!%p149_p6), 9   ;;  %s1339_s25 = smov (!%p149_p6), 117  }
  0x12   : > { %s183_s22 = scalar_select %p182_p7, %s1384_s15, 7 }
  0x13   : > { %s1493_s21 = smov (!%p177_p8, %s1012_s21), 17  ;;  %s1340_s26 = smov 118  }
  0x14   : > { %s1029_s23 = sshll.u32 %s183_s22, 4  ;;  %s1013_s24 = sshll.u32 %s1493_s21, 3 }
  0x15   : > { %s1406_s27 = scalar_lea.vmem %s1486_s2, %s1029_s23  ;;  %s180_s30 = scalar_lea.vmem %s1485_s1, %s1013_s24 }
  0x16   : > { %v1412_v0 = vld [vmem:[%s1406_s27] sm:$0xff]  ;;  %v1414_v1 = vld [vmem:[%s180_s30 + $0x8] sm:$0xff]  ;;  %s1335_s21 = smov 10   ;;  %s1336_s22 = smov 1  }
  0x17   : > { %v188_v2 = vld [vmem:[%s180_s30] sm:$0xff]  ;;  %v1170_v3 = vpack.i.bf16 %v1412_v0, %v1414_v1  ;;  %v193_v4 = vld [vmem:[%s1406_s27 + $0x8] sm:$0xff]  ;;  %s1337_s23 = smov 119   ;;  %s1338_s24 = smov 127  }
  0x18   : > { %202 = vrot.lane.b32.xlu1 %v188_v2, %s1324_s4  ;;  %v1240_v5 = vpack.i.bf16 %v193_v4, %v1412_v0  ;;  %s1341_s27 = smov 38   ;;  %s1342_s28 = smov 39  }
  0x19   : > { %1171 = vrot.lane.b32.xlu0 %v1170_v3, %s1324_s4  ;;  %s1343_s29 = smov 29   ;;  %s1344_s30 = smov 37  }
  0x1a   : > { %s1345_s4 = smov 27  }
  0x1c   : > { %221 = vrot.lane.b32.xlu1 %v188_v2, %s1325_s5 }
  0x1d   : > { %1176 = vrot.lane.b32.xlu0 %v1170_v3, %s1325_s5  ;;  %s1346_s5 = smov 28  }
  0x20   : > { %1186 = vrot.lane.b32.xlu1 %v1170_v3, %s1326_s6 }
  0x21   : > { %1181 = vrot.lane.b32.xlu0 %v1170_v3, %s1327_s7 }
  0x24   : > { %259 = vrot.lane.b32.xlu1 %v188_v2, %s1326_s6  ;;  %s1347_s6 = smov 18  }
  0x25   : > { %240 = vrot.lane.b32.xlu0 %v188_v2, %s1327_s7  ;;  %s1348_s7 = smov 19  }
  0x28   : > { %1196 = vrot.lane.b32.xlu1 %v1170_v3, %s1328_s8 }
  0x29   : > { %1191 = vrot.lane.b32.xlu0 %v1170_v3, %s1329_s9 }
  0x2c   : > { %297 = vrot.lane.b32.xlu1 %v188_v2, %s1328_s8 }
  0x2d   : > { %278 = vrot.lane.b32.xlu0 %v188_v2, %s1329_s9 }
  0x30   : > { %1206 = vrot.lane.b32.xlu1 %v1170_v3, %s1330_s10 }
  0x31   : > { %1201 = vrot.lane.b32.xlu0 %v1170_v3, %s1331_s11 }
  0x34   : > { %335 = vrot.lane.b32.xlu1 %v188_v2, %s1330_s10 }
  0x35   : > { %316 = vrot.lane.b32.xlu0 %v188_v2, %s1331_s11 }
  0x38   : > { %1216 = vrot.lane.b32.xlu1 %v1170_v3, %s1332_s14 }
  0x39   : > { %1211 = vrot.lane.b32.xlu0 %v1170_v3, %s1333_s17 }
  0x3c   : > { %373 = vrot.lane.b32.xlu1 %v188_v2, %s1332_s14  ;;  %s1349_s14 = smov 17  }
  0x3d   : > { %354 = vrot.lane.b32.xlu0 %v188_v2, %s1333_s17 }
  0x40   : > { %1226 = vrot.lane.b32.xlu1 %v1170_v3, %s1334_s18 }
  0x41   : > { %1221 = vrot.lane.b32.xlu0 %v1170_v3, %s1335_s21 }
  0x44   : > { %411 = vrot.lane.b32.xlu1 %v188_v2, %s1334_s18 }
  0x45   : > { %392 = vrot.lane.b32.xlu0 %v188_v2, %s1335_s21 }
  0x48   : > { %430 = vrot.lane.b32.xlu1 %v188_v2, %s1336_s22 }
  0x49   : > { %1231 = vrot.lane.b32.xlu0 %v1170_v3, %s1336_s22 }
  0x4c   : > { %1241 = vrot.lane.b32.xlu1 %v1240_v5, %s1337_s23 }
  0x4d   : > { %1236 = vrot.lane.b32.xlu0 %v1240_v5, %s1338_s24 }
  0x50   : > { %472 = vrot.lane.b32.xlu1 %v1414_v1, %s1337_s23 }
  0x51   : > { %453 = vrot.lane.b32.xlu0 %v1414_v1, %s1338_s24 }
  0x54   : > { %1251 = vrot.lane.b32.xlu1 %v1240_v5, %s1339_s25 }
  0x55   : > { %1246 = vrot.lane.b32.xlu0 %v1240_v5, %s1340_s26 }
  0x58   : > { %510 = vrot.lane.b32.xlu1 %v1414_v1, %s1339_s25 }
  0x59   : > { %491 = vrot.lane.b32.xlu0 %v1414_v1, %s1340_s26 }
  0x5c   : > { %1261 = vrot.lane.b32.xlu1 %v1240_v5, %s1341_s27 }
  0x5d   : > { %1256 = vrot.lane.b32.xlu0 %v1240_v5, %s1342_s28 }
  0x60   : > { %548 = vrot.lane.b32.xlu1 %v1414_v1, %s1341_s27 }
  0x61   : > { %529 = vrot.lane.b32.xlu0 %v1414_v1, %s1342_s28 }
  0x64   : > { %1271 = vrot.lane.b32.xlu1 %v1240_v5, %s1343_s29 }
  0x65   : > { %1266 = vrot.lane.b32.xlu0 %v1240_v5, %s1344_s30 }
  0x68   : > { %586 = vrot.lane.b32.xlu1 %v1414_v1, %s1343_s29 }
  0x69   : > { %567 = vrot.lane.b32.xlu0 %v1414_v1, %s1344_s30 }
  0x6c   : > { %1281 = vrot.lane.b32.xlu1 %v1240_v5, %s1345_s4 }
  0x6d   : > { %1276 = vrot.lane.b32.xlu0 %v1240_v5, %s1346_s5 }
  0x70   : > { %624 = vrot.lane.b32.xlu1 %v1414_v1, %s1345_s4  ;;  %s173_s4 = sand.u32 1, %s1314_s12   ;;  %s1034_s12 = sshll.u32 (%p1396_p4), %s1384_s15, 3 }
  0x71   : > { %605 = vrot.lane.b32.xlu0 %v1414_v1, %s1346_s5  ;;  %s1011_s5 = sshll.u32 %s173_s4, 5  ;;  %s899_s9 = scalar_lea.vmem (%p1396_p4), %s1487_s3, %s1034_s12 }
  0x74   : > { %1291 = vrot.lane.b32.xlu1 %v1240_v5, %s1347_s6 }
  0x75   : > { %1286 = vrot.lane.b32.xlu0 %v1240_v5, %s1348_s7 }
  0x78   : > { %662 = vrot.lane.b32.xlu1 %v1414_v1, %s1347_s6  ;;  %s175_s6 = scalar_lea.vmem [#allocation4], %s1011_s5 }
  0x79   : > { %643 = vrot.lane.b32.xlu0 %v1414_v1, %s1348_s7 }
  0x7c   : > { %681 = vrot.lane.b32.xlu1 %v1414_v1, %s1349_s14 }
  0x7d   : > { %1296 = vrot.lane.b32.xlu0 %v1240_v5, %s1349_s14 }
  0x8a   : > { %v203_v8 = vpop.permute.xlu1 %202 }
  0x8b   : > { %v1172_v9 = vpop.permute.xlu0 %1171 }
  0x8c   : > { %v1174_v10 = vunpack.i.h.bf16 %v1172_v9  ;;  %v1173_v11 = vunpack.i.l.bf16 %v1172_v9 }
  0x8e   : > { %v222_v12 = vpop.permute.xlu1 %221  ;;  %v209_v16 = vsel %vm208_vm1, %v203_v8, %v1173_v11  ;;  %v210_v18 = vsel %vm208_vm1, %v1173_v11, %v1174_v10  ;;  %vm516_vm1 = vcmask 957440  }
  0x8f   : > { %v1177_v13 = vpop.permute.xlu0 %1176 }
  0x90   : > { %v1179_v14 = vunpack.i.h.bf16 %v1177_v13  ;;  %v1178_v15 = vunpack.i.l.bf16 %v1177_v13 }
  0x92   : > { %v1187_v17 = vpop.permute.xlu1 %1186  ;;  %v228_v19 = vsel %vm227_vm2, %v222_v12, %v1178_v15  ;;  %v229_v22 = vsel %vm227_vm2, %v1178_v15, %v1179_v14  ;;  %vm497_vm2 = vcmask 965632  }
  0x93   : > { %v1189_v20 = vunpack.i.h.bf16 %v1187_v17  ;;  %v1188_v21 = vunpack.i.l.bf16 %v1187_v17  ;;  %v1182_v23 = vpop.permute.xlu0 %1181  ;;  %v1035_v24 = vpack.c.bf16 %v229_v22, %v210_v18  ;;  %v1037_v25 = vpack.c.bf16 %v228_v19, %v209_v16 }
  0x94   : > { %v1184_v26 = vunpack.i.h.bf16 %v1182_v23  ;;  %v1183_v27 = vunpack.i.l.bf16 %v1182_v23 }
  0x95   : > { %v267_v28 = vsel %vm265_vm3, %v1188_v21, %v1189_v20  ;;  %1036 = vmatprep.subr.bf16.mxu0 %v1035_v24  ;;  %1091 = vmatprep.subr.bf16.mxu1 %v1035_v24 }
  0x96   : > { %v260_v29 = vpop.permute.xlu1 %259  ;;  %1038 = vmatpush1.bf16.msra.mxu0 %v1037_v25  ;;  %1105 = vmatpush1.bf16.msra.mxu1 %v1037_v25  ;;  %v248_v31 = vsel %vm246_vm4, %v1183_v27, %v1184_v26 }
  0x97   : > { %v266_v30 = vsel %vm265_vm3, %v260_v29, %v1188_v21  ;;  %v241_v32 = vpop.permute.xlu0 %240  ;;  %v1039_v33 = vpack.c.bf16 %v267_v28, %v248_v31  ;;  %vm554_vm3 = vcmask 310272  }
  0x98   : > { %v247_v34 = vsel %vm246_vm4, %v241_v32, %v1183_v27  ;;  %vm535_vm4 = vcmask 318464  }
  0x99   : > { %v1041_v35 = vpack.c.bf16 %v266_v30, %v247_v34  ;;  %1040 = vmatprep.subr.bf16.mxu0 %v1039_v33  ;;  %1092 = vmatprep.subr.bf16.mxu1 %v1039_v33 }
  0x9a   : > { %v1197_v36 = vpop.permute.xlu1 %1196 }
  0x9b   : > { %v1199_v37 = vunpack.i.h.bf16 %v1197_v36  ;;  %v1198_v38 = vunpack.i.l.bf16 %v1197_v36  ;;  %v1192_v39 = vpop.permute.xlu0 %1191  ;;  %1042 = vmatpush1.bf16.msra.mxu0 %v1041_v35  ;;  %1106 = vmatpush1.bf16.msra.mxu1 %v1041_v35 }
  0x9c   : > { %v1194_v40 = vunpack.i.h.bf16 %v1192_v39  ;;  %v1193_v41 = vunpack.i.l.bf16 %v1192_v39 }
  0x9d   : > { %v305_v42 = vsel %vm303_vm5, %v1198_v38, %v1199_v37 }
  0x9e   : > { %v298_v43 = vpop.permute.xlu1 %297  ;;  %v286_v45 = vsel %vm284_vm6, %v1193_v41, %v1194_v40 }
  0x9f   : > { %v304_v44 = vsel %vm303_vm5, %v298_v43, %v1198_v38  ;;  %v279_v46 = vpop.permute.xlu0 %278  ;;  %v1043_v47 = vpack.c.bf16 %v305_v42, %v286_v45  ;;  %vm592_vm5 = vcmask 236544  }
  0xa0   : > { %v285_v48 = vsel %vm284_vm6, %v279_v46, %v1193_v41  ;;  %vm573_vm6 = vcmask 302080  }
  0xa1   : > { %v1045_v49 = vpack.c.bf16 %v304_v44, %v285_v48  ;;  %1044 = vmatprep.subr.bf16.mxu0 %v1043_v47  ;;  %1093 = vmatprep.subr.bf16.mxu1 %v1043_v47 }
  0xa2   : > { %v1207_v50 = vpop.permute.xlu1 %1206 }
  0xa3   : > { %v1209_v51 = vunpack.i.h.bf16 %v1207_v50  ;;  %v1208_v52 = vunpack.i.l.bf16 %v1207_v50  ;;  %v1202_v53 = vpop.permute.xlu0 %1201  ;;  %1046 = vmatpush1.bf16.msra.mxu0 %v1045_v49  ;;  %1107 = vmatpush1.bf16.msra.mxu1 %v1045_v49 }
  0xa4   : > { %v1204_v54 = vunpack.i.h.bf16 %v1202_v53  ;;  %v1203_v55 = vunpack.i.l.bf16 %v1202_v53 }
  0xa5   : > { %v343_v56 = vsel %vm341_vm7, %v1208_v52, %v1209_v51 }
  0xa6   : > { %v336_v57 = vpop.permute.xlu1 %335  ;;  %v324_v59 = vsel %vm322_vm8, %v1203_v55, %v1204_v54 }
  0xa7   : > { %v342_v58 = vsel %vm341_vm7, %v336_v57, %v1208_v52  ;;  %v317_v60 = vpop.permute.xlu0 %316  ;;  %v1047_v61 = vpack.c.bf16 %v343_v56, %v324_v59  ;;  %vm630_vm7 = vcmask 220160  }
  0xa8   : > { %v323_v62 = vsel %vm322_vm8, %v317_v60, %v1203_v55  ;;  %vm611_vm8 = vcmask 228352  }
  0xa9   : > { %v1049_v63 = vpack.c.bf16 %v342_v58, %v323_v62  ;;  %1048 = vmatprep.subr.bf16.mxu0 %v1047_v61  ;;  %1094 = vmatprep.subr.bf16.mxu1 %v1047_v61 }
  0xaa   : > { %v1217_v2 = vpop.permute.xlu1 %1216 }
  0xab   : > { %v1219_v3 = vunpack.i.h.bf16 %v1217_v2  ;;  %v1218_v4 = vunpack.i.l.bf16 %v1217_v2  ;;  %v1212_v5 = vpop.permute.xlu0 %1211  ;;  %1050 = vmatpush1.bf16.msra.mxu0 %v1049_v63  ;;  %1108 = vmatpush1.bf16.msra.mxu1 %v1049_v63 }
  0xac   : > { %v1214_v6 = vunpack.i.h.bf16 %v1212_v5  ;;  %v1213_v7 = vunpack.i.l.bf16 %v1212_v5 }
  0xad   : > { %v381_v8 = vsel %vm379_vm9, %v1218_v4, %v1219_v3 }
  0xae   : > { %v374_v9 = vpop.permute.xlu1 %373  ;;  %v362_v11 = vsel %vm360_vm10, %v1213_v7, %v1214_v6 }
  0xaf   : > { %v380_v10 = vsel %vm379_vm9, %v374_v9, %v1218_v4  ;;  %v355_v12 = vpop.permute.xlu0 %354  ;;  %v1051_v13 = vpack.c.bf16 %v381_v8, %v362_v11  ;;  %vm668_vm9 = vcmask 146432  }
  0xb0   : > { %v361_v14 = vsel %vm360_vm10, %v355_v12, %v1213_v7  ;;  %vm649_vm10 = vcmask 154624  }
  0xb1   : > { %v1053_v15 = vpack.c.bf16 %v380_v10, %v361_v14  ;;  %1052 = vmatprep.subr.bf16.mxu0 %v1051_v13  ;;  %1095 = vmatprep.subr.bf16.mxu1 %v1051_v13 }
  0xb2   : > { %v1227_v16 = vpop.permute.xlu1 %1226 }
  0xb3   : > { %v1229_v17 = vunpack.i.h.bf16 %v1227_v16  ;;  %v1228_v18 = vunpack.i.l.bf16 %v1227_v16  ;;  %v1222_v19 = vpop.permute.xlu0 %1221  ;;  %1054 = vmatpush1.bf16.msra.mxu0 %v1053_v15  ;;  %1109 = vmatpush1.bf16.msra.mxu1 %v1053_v15 }
  0xb4   : > { %v1224_v20 = vunpack.i.h.bf16 %v1222_v19  ;;  %v1223_v21 = vunpack.i.l.bf16 %v1222_v19 }
  0xb5   : > { %v419_v22 = vsel %vm417_vm11, %v1228_v18, %v1229_v17 }
  0xb6   : > { %v412_v23 = vpop.permute.xlu1 %411  ;;  %v400_v25 = vsel %vm398_vm12, %v1223_v21, %v1224_v20 }
  0xb7   : > { %v418_v24 = vsel %vm417_vm11, %v412_v23, %v1228_v18  ;;  %v393_v26 = vpop.permute.xlu0 %392  ;;  %v1055_v27 = vpack.c.bf16 %v419_v22, %v400_v25  ;;  %vm687_vm11 = vcmask 138240  }
  0xb8   : > { %v399_v28 = vsel %vm398_vm12, %v393_v26, %v1223_v21 }
  0xb9   : > { %v1057_v29 = vpack.c.bf16 %v418_v24, %v399_v28  ;;  %1056 = vmatprep.subr.bf16.mxu0 %v1055_v27  ;;  %1096 = vmatprep.subr.bf16.mxu1 %v1055_v27 }
  0xba   : > { %v431_v30 = vpop.permute.xlu1 %430 }
  0xbb   : > { %v1232_v31 = vpop.permute.xlu0 %1231  ;;  %1058 = vmatpush1.bf16.msra.mxu0 %v1057_v29  ;;  %1110 = vmatpush1.bf16.msra.mxu1 %v1057_v29 }
  0xbc   : > { %v1234_v32 = vunpack.i.h.bf16 %v1232_v31  ;;  %v1233_v33 = vunpack.i.l.bf16 %v1232_v31 }
  0xbe   : > { %v1242_v34 = vpop.permute.xlu1 %1241  ;;  %v437_v35 = vsel %vm436_vm13, %v431_v30, %v1233_v33  ;;  %v438_v38 = vsel %vm436_vm13, %v1233_v33, %v1234_v32 }
  0xbf   : > { %v1244_v36 = vunpack.i.h.bf16 %v1242_v34  ;;  %v1243_v37 = vunpack.i.l.bf16 %v1242_v34  ;;  %v1061_v39 = vpack.c.bf16 %v1414_v1, %v437_v35  ;;  %v1237_v40 = vpop.permute.xlu0 %1236  ;;  %v1059_v41 = vpack.c.bf16 %v1412_v0, %v438_v38 }
  0xc0   : > { %v1239_v42 = vunpack.i.h.bf16 %v1237_v40  ;;  %v1238_v43 = vunpack.i.l.bf16 %v1237_v40 }
  0xc1   : > { %v480_v44 = vsel %vm478_vm14, %v1243_v37, %v1244_v36  ;;  %1060 = vmatprep.subr.bf16.mxu0 %v1059_v41  ;;  %1097 = vmatprep.subr.bf16.mxu1 %v1059_v41 }
  0xc2   : > { %v473_v45 = vpop.permute.xlu1 %472  ;;  %1062 = vmatpush1.bf16.msra.mxu0 %v1061_v39  ;;  %1111 = vmatpush1.bf16.msra.mxu1 %v1061_v39  ;;  %v461_v47 = vsel %vm459_vm15, %v1238_v43, %v1239_v42 }
  0xc3   : > { %v479_v46 = vsel %vm478_vm14, %v473_v45, %v1243_v37  ;;  %v454_v48 = vpop.permute.xlu0 %453  ;;  %v1063_v49 = vpack.c.bf16 %v480_v44, %v461_v47 }
  0xc4   : > { %v460_v50 = vsel %vm459_vm15, %v454_v48, %v1238_v43 }
  0xc5   : > { %v1065_v1 = vpack.c.bf16 %v479_v46, %v460_v50  ;;  %1064 = vmatprep.subr.bf16.mxu0 %v1063_v49  ;;  %1098 = vmatprep.subr.bf16.mxu1 %v1063_v49 }
  0xc6   : > { %v1252_v0 = vpop.permute.xlu1 %1251 }
  0xc7   : > { %v1254_v51 = vunpack.i.h.bf16 %v1252_v0  ;;  %v1253_v52 = vunpack.i.l.bf16 %v1252_v0  ;;  %v1247_v53 = vpop.permute.xlu0 %1246  ;;  %1066 = vmatpush1.bf16.msra.mxu0 %v1065_v1  ;;  %1112 = vmatpush1.bf16.msra.mxu1 %v1065_v1 }
  0xc8   : > { %v1249_v54 = vunpack.i.h.bf16 %v1247_v53  ;;  %v1248_v55 = vunpack.i.l.bf16 %v1247_v53 }
  0xc9   : > { %v518_v56 = vsel %vm516_vm1, %v1253_v52, %v1254_v51 }
  0xca   : > { %v511_v57 = vpop.permute.xlu1 %510  ;;  %v499_v59 = vsel %vm497_vm2, %v1248_v55, %v1249_v54 }
  0xcb   : > { %v517_v58 = vsel %vm516_vm1, %v511_v57, %v1253_v52  ;;  %v492_v60 = vpop.permute.xlu0 %491  ;;  %v1067_v61 = vpack.c.bf16 %v518_v56, %v499_v59 }
  0xcc   : > { %v498_v62 = vsel %vm497_vm2, %v492_v60, %v1248_v55 }
  0xcd   : > { %v1069_v63 = vpack.c.bf16 %v517_v58, %v498_v62  ;;  %1068 = vmatprep.subr.bf16.mxu0 %v1067_v61  ;;  %1099 = vmatprep.subr.bf16.mxu1 %v1067_v61  ;;  %v1350_v62 = vmov 1.0  }
  0xce   : > { %v1262_v2 = vpop.permute.xlu1 %1261 }
  0xcf   : > { %v1264_v3 = vunpack.i.h.bf16 %v1262_v2  ;;  %v1263_v4 = vunpack.i.l.bf16 %v1262_v2  ;;  %v1257_v5 = vpop.permute.xlu0 %1256  ;;  %1070 = vmatpush1.bf16.msra.mxu0 %v1069_v63  ;;  %1113 = vmatpush1.bf16.msra.mxu1 %v1069_v63 }
  0xd0   : > { %v1259_v6 = vunpack.i.h.bf16 %v1257_v5  ;;  %v1258_v7 = vunpack.i.l.bf16 %v1257_v5  ;;  %v699_v5 = vld [vmem:[%s1484_s0 + $0x18] sm:$0xff] }
  0xd1   : > { %v556_v8 = vsel %vm554_vm3, %v1263_v4, %v1264_v3  ;;  %v696_v3 = vld [vmem:[%s1484_s0] sm:$0xff] }
  0xd2   : > { %v549_v9 = vpop.permute.xlu1 %548  ;;  %v537_v11 = vsel %vm535_vm4, %v1258_v7, %v1259_v6  ;;  %v703_v6 = vld [vmem:[%s1484_s0 + $0x38] sm:$0xff] }
  0xd3   : > { %v555_v10 = vsel %vm554_vm3, %v549_v9, %v1263_v4  ;;  %v530_v12 = vpop.permute.xlu0 %529  ;;  %v1071_v13 = vpack.c.bf16 %v556_v8, %v537_v11  ;;  %v700_v4 = vld [vmem:[%s1484_s0 + $0x20] sm:$0xff]  ;;  %v702_v8 = vld [vmem:[%s1484_s0 + $0x30] sm:$0xff] }
  0xd4   : > { %v536_v14 = vsel %vm535_vm4, %v530_v12, %v1258_v7  ;;  %v698_v7 = vld [vmem:[%s1484_s0 + $0x10] sm:$0xff] }
  0xd5   : > { %v1073_v15 = vpack.c.bf16 %v555_v10, %v536_v14  ;;  %1072 = vmatprep.subr.bf16.mxu0 %v1071_v13  ;;  %1100 = vmatprep.subr.bf16.mxu1 %v1071_v13 }
  0xd6   : > { %v1272_v16 = vpop.permute.xlu1 %1271 }
  0xd7   : > { %v1274_v17 = vunpack.i.h.bf16 %v1272_v16  ;;  %v1273_v18 = vunpack.i.l.bf16 %v1272_v16  ;;  %v1267_v19 = vpop.permute.xlu0 %1266  ;;  %1074 = vmatpush1.bf16.msra.mxu0 %v1073_v15  ;;  %1114 = vmatpush1.bf16.msra.mxu1 %v1073_v15 }
  0xd8   : > { %v1269_v20 = vunpack.i.h.bf16 %v1267_v19  ;;  %v1268_v21 = vunpack.i.l.bf16 %v1267_v19 }
  0xd9   : > { %v594_v22 = vsel %vm592_vm5, %v1273_v18, %v1274_v17 }
  0xda   : > { %v587_v23 = vpop.permute.xlu1 %586  ;;  %v575_v25 = vsel %vm573_vm6, %v1268_v21, %v1269_v20 }
  0xdb   : > { %v593_v24 = vsel %vm592_vm5, %v587_v23, %v1273_v18  ;;  %v568_v26 = vpop.permute.xlu0 %567  ;;  %v1075_v27 = vpack.c.bf16 %v594_v22, %v575_v25 }
  0xdc   : > { %v574_v28 = vsel %vm573_vm6, %v568_v26, %v1268_v21 }
  0xdd   : > { %v1077_v29 = vpack.c.bf16 %v593_v24, %v574_v28  ;;  %1076 = vmatprep.subr.bf16.mxu0 %v1075_v27  ;;  %1101 = vmatprep.subr.bf16.mxu1 %v1075_v27 }
  0xde   : > { %v1282_v30 = vpop.permute.xlu1 %1281 }
  0xdf   : > { %v1284_v31 = vunpack.i.h.bf16 %v1282_v30  ;;  %v1283_v32 = vunpack.i.l.bf16 %v1282_v30  ;;  %v1277_v33 = vpop.permute.xlu0 %1276  ;;  %1078 = vmatpush1.bf16.msra.mxu0 %v1077_v29  ;;  %1115 = vmatpush1.bf16.msra.mxu1 %v1077_v29 }
  0xe0   : > { %v1279_v34 = vunpack.i.h.bf16 %v1277_v33  ;;  %v1278_v35 = vunpack.i.l.bf16 %v1277_v33 }
  0xe1   : > { %v632_v36 = vsel %vm630_vm7, %v1283_v32, %v1284_v31 }
  0xe2   : > { %v625_v37 = vpop.permute.xlu1 %624  ;;  %v613_v39 = vsel %vm611_vm8, %v1278_v35, %v1279_v34 }
  0xe3   : > { %v631_v38 = vsel %vm630_vm7, %v625_v37, %v1283_v32  ;;  %v606_v40 = vpop.permute.xlu0 %605  ;;  %v1079_v41 = vpack.c.bf16 %v632_v36, %v613_v39 }
  0xe4   : > { %v612_v42 = vsel %vm611_vm8, %v606_v40, %v1278_v35 }
  0xe5   : > { %v1081_v43 = vpack.c.bf16 %v631_v38, %v612_v42  ;;  %1080 = vmatprep.subr.bf16.mxu0 %v1079_v41  ;;  %1102 = vmatprep.subr.bf16.mxu1 %v1079_v41 }
  0xe6   : > { %v1292_v44 = vpop.permute.xlu1 %1291 }
  0xe7   : > { %v1294_v45 = vunpack.i.h.bf16 %v1292_v44  ;;  %v1293_v46 = vunpack.i.l.bf16 %v1292_v44  ;;  %v1287_v47 = vpop.permute.xlu0 %1286  ;;  %1082 = vmatpush1.bf16.msra.mxu0 %v1081_v43  ;;  %1116 = vmatpush1.bf16.msra.mxu1 %v1081_v43 }
  0xe8   : > { %v1289_v48 = vunpack.i.h.bf16 %v1287_v47  ;;  %v1288_v49 = vunpack.i.l.bf16 %v1287_v47 }
  0xe9   : > { %v670_v50 = vsel %vm668_vm9, %v1293_v46, %v1294_v45 }
  0xea   : > { %v663_v1 = vpop.permute.xlu1 %662  ;;  %v651_v51 = vsel %vm649_vm10, %v1288_v49, %v1289_v48 }
  0xeb   : > { %v669_v0 = vsel %vm668_vm9, %v663_v1, %v1293_v46  ;;  %v644_v52 = vpop.permute.xlu0 %643  ;;  %v1083_v53 = vpack.c.bf16 %v670_v50, %v651_v51 }
  0xec   : > { %v650_v54 = vsel %vm649_vm10, %v644_v52, %v1288_v49 }
  0xed   : > { %v1085_v55 = vpack.c.bf16 %v669_v0, %v650_v54  ;;  %1084 = vmatprep.subr.bf16.mxu0 %v1083_v53  ;;  %1103 = vmatprep.subr.bf16.mxu1 %v1083_v53 }
  0xee   : > { %v682_v57 = vpop.permute.xlu1 %681 }
  0xef   : > { %v1297_v56 = vpop.permute.xlu0 %1296  ;;  %1086 = vmatpush1.bf16.msra.mxu0 %v1085_v55  ;;  %1117 = vmatpush1.bf16.msra.mxu1 %v1085_v55 }
  0xf0   : > { %v1299_v58 = vunpack.i.h.bf16 %v1297_v56  ;;  %v1298_v59 = vunpack.i.l.bf16 %v1297_v56 }
  0xf2   : > { %v688_v60 = vsel %vm687_vm11, %v682_v57, %v1298_v59  ;;  %v689_v61 = vsel %vm687_vm11, %v1298_v59, %v1299_v58 }
  0xf3   : > { %v1089_v63 = vpack.c.bf16 %v1350_v62, %v688_v60  ;;  %v1087_v2 = vpack.c.bf16 %v1350_v62, %v689_v61 }
  0xf5   : > { %1088 = vmatprep.subr.bf16.mxu0 %v1087_v2  ;;  %1104 = vmatprep.subr.bf16.mxu1 %v1087_v2 }
  0xf6   : > { %1090 = vmatpush1.bf16.msra.mxu0 %v1089_v63  ;;  %1118 = vmatpush1.bf16.msra.mxu1 %v1089_v63 }
  0xf9   : > { %838 = vmatmul.mubr.f32.vlgmr.msra.gmra.mrb[0].mxu0 %v696_v3  ;;  %850 = vmatmul.mubr.f32.vlgmr.msra.gmra.mrb[0].mxu1 %v700_v4 }
  0xfa   : > { %1017 = vmatprep.mubr.msk.f32.mxu0 %vm760_vm0, %v699_v5  ;;  %1019 = vmatprep.mubr.msk.f32.mxu1 %vm760_vm0, %v703_v6 }
  0xfd   : > { %844 = vmatmul.mubr.f32.gmra.mrb[2].mxu0 %v698_v7  ;;  %856 = vmatmul.mubr.f32.gmra.mrb[2].mxu1 %v702_v8 }
 0x1cc   : > { %v839_v9 = vpop.f32.mrb[0].mxu0  ;;  %v851_v10 = vpop.f32.mrb[0].mxu1 }
 0x1cd   : > { %v841_v11 = vpop.f32.mrb[1].mxu0  ;;  %v853_v12 = vpop.f32.mrb[1].mxu1 }
 0x1ce   : > { %v1030_v13 = vpack.c.bf16 %v841_v11, %v839_v9  ;;  %v1032_v14 = vpack.c.bf16 %v853_v12, %v851_v10  ;;  %896 = sbr.rel (!%p1396_p4) target bundleno = 477 (0x1dd), region = 36 }
 0x1d0   : > { %886 = vst [vmem:[%s175_s6] sm:$0xff] %v1030_v13  ;;  %888 = vst [vmem:[%s175_s6 + $0x10] sm:$0xff] %v1032_v14  ;;  %v845_v15 = vpop.f32.mrb[2].mxu0  ;;  %v857_v16 = vpop.f32.mrb[2].mxu1 }
 0x1d1   : > { %v847_v17 = vpop.f32.mrb[3].mxu0  ;;  %v859_v18 = vpop.f32.mrb[3].mxu1 }
 0x1d2   : > { %v1031_v19 = vpack.c.bf16 %v847_v17, %v845_v15  ;;  %v1033_v20 = vpack.c.bf16 %v859_v18, %v857_v16 }
 0x1d4   : > { %887 = vst [vmem:[%s175_s6 + $0x8] sm:$0xff] %v1031_v19  ;;  %889 = vst [vmem:[%s175_s6 + $0x18] sm:$0xff] %v1033_v20 }
 0x1d7   : > { %v933_v21 = vld [vmem:[%s175_s6] sm:$0xff]  ;;  %v937_v23 = vld [vmem:[%s175_s6 + $0x10] sm:$0xff] }
 0x1d8   : > { %934 = vst [vmem:[%s899_s9] sm:$0xff] %v933_v21  ;;  %938 = vst [vmem:[%s899_s9 + $0x80] sm:$0xff] %v937_v23 }
 0x1db   : > { %v935_v22 = vld [vmem:[%s175_s6 + $0x8] sm:$0xff]  ;;  %v939_v24 = vld [vmem:[%s175_s6 + $0x18] sm:$0xff] }
 0x1dc   : > { %936 = vst [vmem:[%s899_s9 + $0x40] sm:$0xff] %v935_v22  ;;  %940 = vst [vmem:[%s899_s9 + $0xc0] sm:$0xff] %v939_v24 }
 0x1dd PF: > { %p10_p9 = scmp.ge.s32.totalorder %s1386_s16, 10   ;;  %s1489_s12 = smov %s1318_s13 }
 0x1de   : > { %s1490_s13 = smov %s1394_s19  ;;  %s1491_s14 = smov %s1386_s16 }
 0x1df   :  { %12 = sbr.rel (!%p10_p9) target bundleno = 2 (0x2), region = 103 }

</bundles_post_ra>
